<compile_context>
chip_gen: v7x
topology: tpu7x:2x2x1
jax: 0.10.0
libtpu: 0.0.40
codegen_flags: <defaults>
</compile_context>

<pallas_src>
import jax
import jax.numpy as jnp
from jax.experimental import pallas as pl
from jax.experimental.pallas import tpu as pltpu

BN_EPS = 1e-5   # nn.BatchNorm1d default
LANE = 128      # TPU lane width

_VMEM = pl.BlockSpec(memory_space=pltpu.MemorySpace.VMEM)


# ---------------------------------------------------------------------------
# Fused Pallas kernel: every GraphConv (+BN+ReLU) layer in one invocation.
# ---------------------------------------------------------------------------
def _gcn_fused_kernel(adj_ref, x_ref, wh_ref, ph_ref, wo_ref, bo_ref, out_ref):
    num_hidden = wh_ref.shape[0]
    adj = adj_ref[...]                     # (N, N) bf16, resident for ALL layers
    h = x_ref[...]                         # (N, Fpad) f32, stays on-chip

    for l in range(num_hidden):            # static unroll; layers are few & sequential
        # aggregate:  Ahat @ H        (bf16 x bf16 MXU, f32 accumulation)
        agg = jnp.dot(adj, h.astype(jnp.bfloat16),
                      preferred_element_type=jnp.float32)
        # project:    agg @ W + b
        p = ph_ref[l]                      # (3, Fpad): rows = bias, gamma, beta
        z = jnp.dot(agg, wh_ref[l], preferred_element_type=jnp.float32) + p[0:1, :]
        # BatchNorm1d (training-mode, biased batch statistics over the node axis)
        mu = jnp.mean(z, axis=0, keepdims=True)
        var = jnp.mean((z - mu) ** 2, axis=0, keepdims=True)
        zn = (z - mu) * jax.lax.rsqrt(var + BN_EPS)
        zn = zn * p[1:2, :] + p[2:3, :]
        # ReLU; dropout p=0 -> identity
        # TODO(synk): dropout with p>0 (training) would need pltpu.prng_* masking.
        h = jnp.maximum(zn, 0.0)

    # output GraphConv, reassociated:  Ahat @ (H @ Wout) + b
    hw = jnp.dot(h, wo_ref[...], preferred_element_type=jnp.float32)
    out_ref[...] = jnp.dot(adj, hw.astype(jnp.bfloat16),
                           preferred_element_type=jnp.float32) + bo_ref[...]


# ---------------------------------------------------------------------------
# Wrapper: pack/pad parameters, single pallas_call, slice off lane padding.
# ---------------------------------------------------------------------------
def _round_up(v, m):
    return ((v + m - 1) // m) * m


def _pad2(a, rows, cols):
    return jnp.pad(a, ((0, rows - a.shape[0]), (0, cols - a.shape[1])))


def gcn_forward(adj_hat, x, params):
    """Mirrors GCN.forward as a single fused pallas_call."""
    n = adj_hat.shape[0]
    hidden = params["hidden"]
    w_out, b_out = params["out"]
    in_feats = x.shape[1]
    h_feats = hidden[0][0].shape[1]
    num_classes = w_out.shape[1]

    fpad = _round_up(max(in_feats, h_feats), LANE)   # lane-dense hidden width
    cpad = _round_up(num_classes, LANE)              # lane-dense output width

    # Zero padding is exact: padded rows/cols of W and padded bias/gamma/beta
    # are 0, so padded feature columns stay identically 0 through the matmuls,
    # BN (0 * rsqrt(eps) * 0 + 0 = 0) and ReLU — real columns are unchanged.
    wh = jnp.stack([_pad2(w, fpad, fpad) for (w, _, _, _) in hidden])      # (L, Fp, Fp)
    ph = jnp.stack([jnp.concatenate(
            [_pad2(b, 1, fpad), _pad2(g, 1, fpad), _pad2(bt, 1, fpad)], axis=0)
            for (_, b, g, bt) in hidden])                                  # (L, 3, Fp)
    wo = _pad2(w_out, fpad, cpad)
    bo = _pad2(b_out, 1, cpad)
    x_p = _pad2(x, n, fpad)
    adj_bf16 = adj_hat.astype(jnp.bfloat16)          # halve bytes of the O(N^2) object

    out_padded = pl.pallas_call(
        _gcn_fused_kernel,
        out_shape=jax.ShapeDtypeStruct((n, cpad), jnp.float32),
        in_specs=[_VMEM] * 6,
        out_specs=_VMEM,
    )(adj_bf16, x_p, wh, ph, wo, bo)
    return out_padded[:, :num_classes]


# ---------------------------------------------------------------------------
# Plain-JAX reference of the exact same math (for the in-script check).
# ---------------------------------------------------------------------------
def gcn_reference(adj_hat, x, params):
    adj = adj_hat.astype(jnp.bfloat16)
    h = x
    for (w, b, gamma, beta) in params["hidden"]:
        agg = jnp.dot(adj, h.astype(jnp.bfloat16), preferred_element_type=jnp.float32)
        z = jnp.dot(agg, w, preferred_element_type=jnp.float32) + b
        mu = jnp.mean(z, axis=0, keepdims=True)
        var = jnp.mean((z - mu) ** 2, axis=0, keepdims=True)
        zn = (z - mu) * jax.lax.rsqrt(var + BN_EPS) * gamma + beta
        h = jnp.maximum(zn, 0.0)
    w_out, b_out = params["out"]
    hw = jnp.dot(h, w_out, preferred_element_type=jnp.float32)
    return jnp.dot(adj, hw.astype(jnp.bfloat16),
                   preferred_element_type=jnp.float32) + b_out


# ---------------------------------------------------------------------------
# Deterministic parameter / graph construction (glue, plain JAX)
# ---------------------------------------------------------------------------
def init_params(key, in_feats, h_feats, num_classes, num_layers):
    dims = [in_feats] + [h_feats] * (num_layers - 1) + [num_classes]
    hidden = []
    keys = jax.random.split(key, num_layers)
    for i in range(num_layers - 1):
        fin, fout = dims[i], dims[i + 1]
        scale = jnp.sqrt(6.0 / (fin + fout))  # xavier-uniform-like
        w = jax.random.uniform(keys[i], (fin, fout), jnp.float32, -scale, scale)
        b = jnp.zeros((1, fout), jnp.float32)
        # nontrivial (but deterministic) affine BN params
        gk, bk = jax.random.split(jax.random.fold_in(keys[i], 7))
        gamma = 1.0 + 0.1 * jax.random.normal(gk, (1, fout), jnp.float32)
        beta = 0.1 * jax.random.normal(bk, (1, fout), jnp.float32)
        hidden.append((w, b, gamma, beta))
    fin, fout = dims[-2], dims[-1]
    scale = jnp.sqrt(6.0 / (fin + fout))
    w_out = jax.random.uniform(keys[-1], (fin, fout), jnp.float32, -scale, scale)
    b_out = jnp.zeros((1, fout), jnp.float32)
    return {"hidden": hidden, "out": (w_out, b_out)}


def build_adj_hat(key, n):
    """Random undirected graph with self-loops, symmetrically normalized."""
    p = jax.random.uniform(key, (n, n))
    a = ((p + p.T) > 1.2).astype(jnp.float32)
    a = jnp.minimum(a + jnp.eye(n, dtype=jnp.float32), 1.0)  # self-loops => deg > 0
    deg = a.sum(axis=1)
    d_inv_sqrt = 1.0 / jnp.sqrt(deg)
    return a * d_inv_sqrt[:, None] * d_inv_sqrt[None, :]


if __name__ == "__main__":
    N = 16            # nodes in the graph
    in_feats = 16
    h_feats = 32
    num_classes = 4
    num_layers = 3    # conv dims: 16->32, 32->32, 32->4

    key = jax.random.PRNGKey(0)
    k_adj, k_feat, k_param = jax.random.split(key, 3)

    adj_hat = build_adj_hat(k_adj, N)
    x = jax.random.normal(k_feat, (N, in_feats), jnp.float32)
    params = init_params(k_param, in_feats, h_feats, num_classes, num_layers)

    fwd = jax.jit(gcn_forward)
    out = fwd(adj_hat, x, params)
    jax.block_until_ready(out)

    ref = gcn_reference(adj_hat, x, params)
    assert out.shape == (N, num_classes), out.shape
    assert jnp.all(jnp.isfinite(out))
    assert jnp.allclose(out, ref, rtol=1e-2, atol=1e-2), float(jnp.max(jnp.abs(out - ref)))
    print("KERNEL_OK")
</pallas_src>

<mosaic_0001>
module attributes {stable_mosaic.version = 11 : i64} {
  func.func @_gcn_fused_kernel(%arg0: memref<16x16xbf16, #tpu.memory_space<vmem>>, %arg1: memref<16x128xf32, #tpu.memory_space<vmem>>, %arg2: memref<2x128x128xf32, #tpu.memory_space<vmem>>, %arg3: memref<2x3x128xf32, #tpu.memory_space<vmem>>, %arg4: memref<128x128xf32, #tpu.memory_space<vmem>>, %arg5: memref<1x128xf32, #tpu.memory_space<vmem>>, %arg6: memref<16x128xf32, #tpu.memory_space<vmem>>) attributes {dimension_semantics = [], scalar_prefetch = 0 : i64, scratch_operands = 0 : i64, tpu.core_type = #tpu.core_type<tc>} {
    %c0 = arith.constant 0 : index
    %c0_0 = arith.constant 0 : index
    %0 = vector.load %arg0[%c0, %c0_0] : memref<16x16xbf16, #tpu.memory_space<vmem>>, vector<16x16xbf16>
    %c0_1 = arith.constant 0 : index
    %c0_2 = arith.constant 0 : index
    %1 = vector.load %arg1[%c0_1, %c0_2] : memref<16x128xf32, #tpu.memory_space<vmem>>, vector<16x128xf32>
    %2 = arith.truncf %1 : vector<16x128xf32> to vector<16x128xbf16>
    %cst = arith.constant dense<0.000000e+00> : vector<16x128xf32>
    %3 = tpu.matmul %0, %2, %cst {dimension_numbers = #tpu.dot_dimension_numbers<[1], [0], [0], [1], [0, 0, 1, 1], [], []>} : vector<16x16xbf16>, vector<16x128xbf16>, vector<16x128xf32> -> vector<16x128xf32>
    %c0_3 = arith.constant 0 : index
    %c0_4 = arith.constant 0 : index
    %c0_5 = arith.constant 0 : index
    %4 = vector.load %arg3[%c0_3, %c0_4, %c0_5] : memref<2x3x128xf32, #tpu.memory_space<vmem>>, vector<1x3x128xf32>
    %5 = vector.shape_cast %4 : vector<1x3x128xf32> to vector<3x128xf32>
    %c0_6 = arith.constant 0 : index
    %c0_7 = arith.constant 0 : index
    %c0_8 = arith.constant 0 : index
    %6 = vector.load %arg2[%c0_6, %c0_7, %c0_8] : memref<2x128x128xf32, #tpu.memory_space<vmem>>, vector<1x128x128xf32>
    %7 = vector.shape_cast %6 : vector<1x128x128xf32> to vector<128x128xf32>
    %cst_9 = arith.constant dense<0.000000e+00> : vector<16x128xf32>
    %8 = tpu.matmul %3, %7, %cst_9 {dimension_numbers = #tpu.dot_dimension_numbers<[1], [0], [0], [1], [0, 0, 1, 1], [], []>} : vector<16x128xf32>, vector<128x128xf32>, vector<16x128xf32> -> vector<16x128xf32>
    %9 = vector.extract_strided_slice %5 {offsets = [0, 0], sizes = [1, 128], strides = [1, 1]} : vector<3x128xf32> to vector<1x128xf32>
    %10 = vector.broadcast %9 : vector<1x128xf32> to vector<16x128xf32>
    %11 = arith.addf %8, %10 : vector<16x128xf32>
    %cst_10 = arith.constant dense<0.000000e+00> : vector<128xf32>
    %12 = vector.multi_reduction <add>, %11, %cst_10 [0] : vector<16x128xf32> to vector<128xf32>
    %13 = vector.shape_cast %12 : vector<128xf32> to vector<1x128xf32>
    %cst_11 = arith.constant 1.600000e+01 : f32
    %14 = vector.broadcast %cst_11 : f32 to vector<1x128xf32>
    %15 = arith.divf %13, %14 : vector<1x128xf32>
    %16 = vector.broadcast %15 : vector<1x128xf32> to vector<16x128xf32>
    %17 = arith.subf %11, %16 : vector<16x128xf32>
    %18 = arith.mulf %17, %17 : vector<16x128xf32>
    %cst_12 = arith.constant dense<0.000000e+00> : vector<128xf32>
    %19 = vector.multi_reduction <add>, %18, %cst_12 [0] : vector<16x128xf32> to vector<128xf32>
    %20 = vector.shape_cast %19 : vector<128xf32> to vector<1x128xf32>
    %cst_13 = arith.constant 1.600000e+01 : f32
    %21 = vector.broadcast %cst_13 : f32 to vector<1x128xf32>
    %22 = arith.divf %20, %21 : vector<1x128xf32>
    %23 = vector.broadcast %15 : vector<1x128xf32> to vector<16x128xf32>
    %24 = arith.subf %11, %23 : vector<16x128xf32>
    %cst_14 = arith.constant 9.99999974E-6 : f32
    %25 = vector.broadcast %cst_14 : f32 to vector<1x128xf32>
    %26 = arith.addf %22, %25 : vector<1x128xf32>
    %27 = math.rsqrt %26 : vector<1x128xf32>
    %28 = vector.broadcast %27 : vector<1x128xf32> to vector<16x128xf32>
    %29 = arith.mulf %24, %28 : vector<16x128xf32>
    %30 = vector.extract_strided_slice %5 {offsets = [1, 0], sizes = [1, 128], strides = [1, 1]} : vector<3x128xf32> to vector<1x128xf32>
    %31 = vector.broadcast %30 : vector<1x128xf32> to vector<16x128xf32>
    %32 = arith.mulf %29, %31 : vector<16x128xf32>
    %33 = vector.extract_strided_slice %5 {offsets = [2, 0], sizes = [1, 128], strides = [1, 1]} : vector<3x128xf32> to vector<1x128xf32>
    %34 = vector.broadcast %33 : vector<1x128xf32> to vector<16x128xf32>
    %35 = arith.addf %32, %34 : vector<16x128xf32>
    %cst_15 = arith.constant 0.000000e+00 : f32
    %36 = vector.broadcast %cst_15 : f32 to vector<16x128xf32>
    %37 = arith.maximumf %35, %36 : vector<16x128xf32>
    %38 = arith.truncf %37 : vector<16x128xf32> to vector<16x128xbf16>
    %cst_16 = arith.constant dense<0.000000e+00> : vector<16x128xf32>
    %39 = tpu.matmul %0, %38, %cst_16 {dimension_numbers = #tpu.dot_dimension_numbers<[1], [0], [0], [1], [0, 0, 1, 1], [], []>} : vector<16x16xbf16>, vector<16x128xbf16>, vector<16x128xf32> -> vector<16x128xf32>
    %c1 = arith.constant 1 : index
    %c0_17 = arith.constant 0 : index
    %c0_18 = arith.constant 0 : index
    %40 = vector.load %arg3[%c1, %c0_17, %c0_18] : memref<2x3x128xf32, #tpu.memory_space<vmem>>, vector<1x3x128xf32>
    %41 = vector.shape_cast %40 : vector<1x3x128xf32> to vector<3x128xf32>
    %c1_19 = arith.constant 1 : index
    %c0_20 = arith.constant 0 : index
    %c0_21 = arith.constant 0 : index
    %42 = vector.load %arg2[%c1_19, %c0_20, %c0_21] : memref<2x128x128xf32, #tpu.memory_space<vmem>>, vector<1x128x128xf32>
    %43 = vector.shape_cast %42 : vector<1x128x128xf32> to vector<128x128xf32>
    %cst_22 = arith.constant dense<0.000000e+00> : vector<16x128xf32>
    %44 = tpu.matmul %39, %43, %cst_22 {dimension_numbers = #tpu.dot_dimension_numbers<[1], [0], [0], [1], [0, 0, 1, 1], [], []>} : vector<16x128xf32>, vector<128x128xf32>, vector<16x128xf32> -> vector<16x128xf32>
    %45 = vector.extract_strided_slice %41 {offsets = [0, 0], sizes = [1, 128], strides = [1, 1]} : vector<3x128xf32> to vector<1x128xf32>
    %46 = vector.broadcast %45 : vector<1x128xf32> to vector<16x128xf32>
    %47 = arith.addf %44, %46 : vector<16x128xf32>
    %cst_23 = arith.constant dense<0.000000e+00> : vector<128xf32>
    %48 = vector.multi_reduction <add>, %47, %cst_23 [0] : vector<16x128xf32> to vector<128xf32>
    %49 = vector.shape_cast %48 : vector<128xf32> to vector<1x128xf32>
    %cst_24 = arith.constant 1.600000e+01 : f32
    %50 = vector.broadcast %cst_24 : f32 to vector<1x128xf32>
    %51 = arith.divf %49, %50 : vector<1x128xf32>
    %52 = vector.broadcast %51 : vector<1x128xf32> to vector<16x128xf32>
    %53 = arith.subf %47, %52 : vector<16x128xf32>
    %54 = arith.mulf %53, %53 : vector<16x128xf32>
    %cst_25 = arith.constant dense<0.000000e+00> : vector<128xf32>
    %55 = vector.multi_reduction <add>, %54, %cst_25 [0] : vector<16x128xf32> to vector<128xf32>
    %56 = vector.shape_cast %55 : vector<128xf32> to vector<1x128xf32>
    %cst_26 = arith.constant 1.600000e+01 : f32
    %57 = vector.broadcast %cst_26 : f32 to vector<1x128xf32>
    %58 = arith.divf %56, %57 : vector<1x128xf32>
    %59 = vector.broadcast %51 : vector<1x128xf32> to vector<16x128xf32>
    %60 = arith.subf %47, %59 : vector<16x128xf32>
    %cst_27 = arith.constant 9.99999974E-6 : f32
    %61 = vector.broadcast %cst_27 : f32 to vector<1x128xf32>
    %62 = arith.addf %58, %61 : vector<1x128xf32>
    %63 = math.rsqrt %62 : vector<1x128xf32>
    %64 = vector.broadcast %63 : vector<1x128xf32> to vector<16x128xf32>
    %65 = arith.mulf %60, %64 : vector<16x128xf32>
    %66 = vector.extract_strided_slice %41 {offsets = [1, 0], sizes = [1, 128], strides = [1, 1]} : vector<3x128xf32> to vector<1x128xf32>
    %67 = vector.broadcast %66 : vector<1x128xf32> to vector<16x128xf32>
    %68 = arith.mulf %65, %67 : vector<16x128xf32>
    %69 = vector.extract_strided_slice %41 {offsets = [2, 0], sizes = [1, 128], strides = [1, 1]} : vector<3x128xf32> to vector<1x128xf32>
    %70 = vector.broadcast %69 : vector<1x128xf32> to vector<16x128xf32>
    %71 = arith.addf %68, %70 : vector<16x128xf32>
    %cst_28 = arith.constant 0.000000e+00 : f32
    %72 = vector.broadcast %cst_28 : f32 to vector<16x128xf32>
    %73 = arith.maximumf %71, %72 : vector<16x128xf32>
    %c0_29 = arith.constant 0 : index
    %c0_30 = arith.constant 0 : index
    %74 = vector.load %arg4[%c0_29, %c0_30] : memref<128x128xf32, #tpu.memory_space<vmem>>, vector<128x128xf32>
    %cst_31 = arith.constant dense<0.000000e+00> : vector<16x128xf32>
    %75 = tpu.matmul %73, %74, %cst_31 {dimension_numbers = #tpu.dot_dimension_numbers<[1], [0], [0], [1], [0, 0, 1, 1], [], []>} : vector<16x128xf32>, vector<128x128xf32>, vector<16x128xf32> -> vector<16x128xf32>
    %76 = arith.truncf %75 : vector<16x128xf32> to vector<16x128xbf16>
    %cst_32 = arith.constant dense<0.000000e+00> : vector<16x128xf32>
    %77 = tpu.matmul %0, %76, %cst_32 {dimension_numbers = #tpu.dot_dimension_numbers<[1], [0], [0], [1], [0, 0, 1, 1], [], []>} : vector<16x16xbf16>, vector<16x128xbf16>, vector<16x128xf32> -> vector<16x128xf32>
    %c0_33 = arith.constant 0 : index
    %c0_34 = arith.constant 0 : index
    %78 = vector.load %arg5[%c0_33, %c0_34] : memref<1x128xf32, #tpu.memory_space<vmem>>, vector<1x128xf32>
    %79 = vector.broadcast %78 : vector<1x128xf32> to vector<16x128xf32>
    %80 = arith.addf %77, %79 : vector<16x128xf32>
    %c0_35 = arith.constant 0 : index
    %c0_36 = arith.constant 0 : index
    %81 = vector.load %arg6[%c0_35, %c0_36] : memref<16x128xf32, #tpu.memory_space<vmem>>, vector<16x128xf32>
    tpu.vector_store %arg6[%c0_35, %c0_36], %80 {strides = array<i32>} : memref<16x128xf32, #tpu.memory_space<vmem>>, vector<16x128xf32>,
    return
  }
}

</mosaic_0001>

<bundles_post_ra>
// kernel: gcn_forward.1
= control target key start
LH: loop header
LB: loop body
LE: loop exit
PB: predicated region body
PF: predicated region fallthrough
CT: control target
= control target key end

     0   :  { %v846_v0 = vmov 0.0   ;;  %vm847_vm0 = vmmov 0   ;;  %vm34_vm1 = vcmask 130048   ;;  %v96_v33 = vlaneseq  ;;  %s1085_s1 = inlined_call_operand.vmem [shape: f32[16,128], index: 1, kind: input, shape index: {}]   ;;  %s1086_s0 = inlined_call_operand.vmem [shape: bf16[16,16], index: 0, kind: input, shape index: {}]   ;;  %s1087_s2 = inlined_call_operand.vmem [shape: f32[2,128,128], index: 2, kind: input, shape index: {}]   ;;  %s1088_s3 = inlined_call_operand.vmem [shape: f32[2,3,128], index: 3, kind: input, shape index: {}]   ;;  %s1089_s4 = inlined_call_operand.vmem [shape: f32[128,128], index: 4, kind: input, shape index: {}]   ;;  %s1090_s5 = inlined_call_operand.vmem [shape: f32[1,128], index: 5, kind: input, shape index: {}]   ;;  %s1091_s6 = inlined_call_operand.vmem [shape: f32[16,128], index: 6, kind: output, shape index: {}]  }
   0x1   :  { %620 = vmatprep.subr.bf16.mxu0 %v846_v0  ;;  %v26_v1 = vld [vmem:[%s1085_s1] sm:$0xff]  ;;  %v27_v2 = vld [vmem:[%s1085_s1 + $0x8] sm:$0xff]  ;;  %622 = vmatprep.mubr.msk.bf16.mxu0 %vm847_vm0, %v846_v0  ;;  %v82_v7 = vld [vmem:[%s1087_s2 + $0x10] sm:$0xff] }
   0x2   :  { %v28_v3 = vpack.c.bf16 %v27_v2, %v26_v1  ;;  %v895_v4 = vld [vmem:[%s1086_s0] sm:$0xff]   ;;  %v81_v6 = vld [vmem:[%s1087_s2 + $0x8] sm:$0xff]  ;;  %v83_v8 = vld [vmem:[%s1087_s2 + $0x18] sm:$0xff]  ;;  %v950_v34 = vshrl.u32 %v96_v33, 7 }
   0x3   :  { %v80_v5 = vld [vmem:[%s1087_s2] sm:$0xff]  ;;  %v747_v10 = vpack.c.bf16 %v83_v8, %v82_v7  ;;  %v85_v12 = vld [vmem:[%s1087_s2 + $0x28] sm:$0xff]  ;;  %v86_v14 = vld [vmem:[%s1087_s2 + $0x30] sm:$0xff] }
   0x4   :  { %621 = vmatpush3.bf16.msra.mxu0 %v28_v3  ;;  %v743_v9 = vpack.c.bf16 %v81_v6, %v80_v5  ;;  %v84_v11 = vld [vmem:[%s1087_s2 + $0x20] sm:$0xff]  ;;  %v87_v15 = vld [vmem:[%s1087_s2 + $0x38] sm:$0xff]  ;;  %v89_v18 = vld [vmem:[%s1087_s2 + $0x48] sm:$0xff]  ;;  %v98_v35 = vsub.s32 0, %v950_v34  ;;  %v202_v63 = vsub.s32 1, %v950_v34  ;;  %v208_v1 = vsub.s32 2, %v950_v34 }
   0x5   :  { %661 = vmatprep.subr.bf16.mxu0 %v846_v0  ;;  %v751_v13 = vpack.c.bf16 %v85_v12, %v84_v11  ;;  %v755_v16 = vpack.c.bf16 %v87_v15, %v86_v14  ;;  %v88_v17 = vld [vmem:[%s1087_s2 + $0x40] sm:$0xff]  ;;  %v90_v20 = vld [vmem:[%s1087_s2 + $0x50] sm:$0xff]  ;;  %v91_v21 = vld [vmem:[%s1087_s2 + $0x58] sm:$0xff] }
   0x6   :  { %744 = vmatprep.subr.bf16.mxu1 %v743_v9  ;;  %v759_v19 = vpack.c.bf16 %v89_v18, %v88_v17  ;;  %v763_v22 = vpack.c.bf16 %v91_v21, %v90_v20  ;;  %v92_v23 = vld [vmem:[%s1087_s2 + $0x60] sm:$0xff]  ;;  %v93_v24 = vld [vmem:[%s1087_s2 + $0x68] sm:$0xff]  ;;  %v94_v26 = vld [vmem:[%s1087_s2 + $0x70] sm:$0xff] }
   0x7   :  { %623 = vmatmul.mubr.msk.bf16.vlgmr.msra.gmra.mrb[0].mxu0 %vm34_vm1, %v895_v4  ;;  %746 = vmatpush3.bf16.msra.mxu1 %v743_v9  ;;  %v767_v25 = vpack.c.bf16 %v93_v24, %v92_v23  ;;  %v95_v27 = vld [vmem:[%s1087_s2 + $0x78] sm:$0xff]  ;;  %v79_v36 = vld [vmem:[%s1088_s3] sm:$0x7]  ;;  %v544_v18 = vld [vmem:[%s1087_s2 + $0x90] sm:$0xff] }
   0x8   :  { %748 = vmatprep.subr.bf16.mxu1 %v747_v10  ;;  %663 = vmatprep.mubr.msk.bf16.mxu0 %vm847_vm0, %v846_v0  ;;  %v771_v28 = vpack.c.bf16 %v95_v27, %v94_v26  ;;  %v99_v37 = vrot.slane %v79_v36, %v98_v35  ;;  %v203_v2 = vrot.slane %v79_v36, %v202_v63  ;;  %v542_v12 = vld [vmem:[%s1087_s2 + $0x80] sm:$0xff]  ;;  %v548_v24 = vld [vmem:[%s1087_s2 + $0xb0] sm:$0xff] }
   0x9   :  { %v209_v5 = vrot.slane %v79_v36, %v208_v1  ;;  %v546_v21 = vld [vmem:[%s1087_s2 + $0xa0] sm:$0xff]  ;;  %v555_v36 = vld [vmem:[%s1087_s2 + $0xe8] sm:$0xff] }
   0xa   :  { %v550_v27 = vld [vmem:[%s1087_s2 + $0xc0] sm:$0xff] }
   0xb   :  { %750 = vmatpush3.bf16.msra.mxu1 %v747_v10  ;;  %v554_v33 = vld [vmem:[%s1087_s2 + $0xe0] sm:$0xff] }
   0xc   :  { %752 = vmatprep.subr.bf16.mxu1 %v751_v13  ;;  %v558_v34 = vld [vmem:[%s1090_s5] ss:$0 sm:$0xff] }
   0xf   :  { %754 = vmatpush3.bf16.msra.mxu1 %v751_v13  ;;  %v543_v13 = vld [vmem:[%s1087_s2 + $0x88] sm:$0xff] }
  0x10   :  { %756 = vmatprep.subr.bf16.mxu1 %v755_v16 }
  0x13   :  { %758 = vmatpush3.bf16.msra.mxu1 %v755_v16  ;;  %v775_v16 = vpack.c.bf16 %v543_v13, %v542_v12 }
  0x14   :  { %760 = vmatprep.subr.bf16.mxu1 %v759_v19 }
  0x17   :  { %762 = vmatpush3.bf16.msra.mxu1 %v759_v19  ;;  %v545_v19 = vld [vmem:[%s1087_s2 + $0x98] sm:$0xff] }
  0x18   :  { %764 = vmatprep.subr.bf16.mxu1 %v763_v22  ;;  %v779_v20 = vpack.c.bf16 %v545_v19, %v544_v18 }
  0x1b   :  { %766 = vmatpush3.bf16.msra.mxu1 %v763_v22  ;;  %v547_v22 = vld [vmem:[%s1087_s2 + $0xa8] sm:$0xff] }
  0x1c   :  { %768 = vmatprep.subr.bf16.mxu1 %v767_v25  ;;  %v783_v23 = vpack.c.bf16 %v547_v22, %v546_v21 }
  0x1f   :  { %770 = vmatpush3.bf16.msra.mxu1 %v767_v25  ;;  %v549_v25 = vld [vmem:[%s1087_s2 + $0xb8] sm:$0xff] }
  0x20   :  { %772 = vmatprep.subr.bf16.mxu1 %v771_v28  ;;  %v787_v26 = vpack.c.bf16 %v549_v25, %v548_v24 }
  0x23   :  { %774 = vmatpush3.bf16.msra.mxu1 %v771_v28  ;;  %v551_v28 = vld [vmem:[%s1087_s2 + $0xc8] sm:$0xff] }
  0xda   :  { %v72_v29 = vpop.f32.mrb[0].mxu0 }
  0xdb   :  { %v624_v30 = vpop.f32.mrb[1].mxu0  ;;  %658 = vmatprep.mubr.f32.mxu1 %v72_v29  ;;  %v791_v29 = vpack.c.bf16 %v551_v28, %v550_v27 }
  0xdc   :  { %v75_v31 = vpop.f32.mrb[2].mxu0  ;;  %v552_v30 = vld [vmem:[%s1087_s2 + $0xd0] sm:$0xff] }
  0xdd   :  { %v625_v32 = vpop.f32.mrb[3].mxu0  ;;  %659 = vmatmul.mubr.f32.vlgmr.msra.gmra.mrb[0].mxu1 %v75_v31  ;;  %v553_v31 = vld [vmem:[%s1087_s2 + $0xd8] sm:$0xff] }
  0xde   :  { %v795_v32 = vpack.c.bf16 %v553_v31, %v552_v30 }
 0x1b0   :  { %v660_v38 = vpop.f32.mrb[0].mxu1 }
 0x1b1   :  { %v172_v39 = vadd.f32 %v660_v38, %v99_v37  ;;  %v166_v40 = vpop.f32.mrb[1].mxu1  ;;  %v556_v38 = vld [vmem:[%s1087_s2 + $0xf0] sm:$0xff] }
 0x1b2   :  { %v167_v41 = vadd.f32 %v166_v40, %v99_v37  ;;  %v799_v37 = vpack.c.bf16 %v555_v36, %v554_v33 }
 0x1b4   :  { %v175_v42 = vadd.f32 %v172_v39, %v167_v41 }
 0x1b6   :  { %v176_v43 = vrot.slane %v175_v42, 4 }
 0x1b8   :  { %v177_v44 = vadd.f32 %v176_v43, %v175_v42 }
 0x1ba   :  { %v178_v45 = vrot.slane %v177_v44, 2 }
 0x1bc   :  { %v179_v46 = vadd.f32 %v178_v45, %v177_v44  ;;  %v392_v45 = vld [vmem:[%s1089_s4] sm:$0xff] }
 0x1be   :  { %v180_v47 = vrot.slane %v179_v46, 1 }
 0x1c0   :  { %v181_v48 = vadd.f32 %v180_v47, %v179_v46  ;;  %v393_v46 = vld [vmem:[%s1089_s4 + $0x8] sm:$0xff] }
 0x1c1   :  { %v807_v47 = vpack.c.bf16 %v393_v46, %v392_v45 }
 0x1c2   :  { %v183_v49 = vmul.f32 0.0625, %v181_v48  ;;  %v394_v48 = vld [vmem:[%s1089_s4 + $0x10] sm:$0xff] }
 0x1c3   :  { %808 = vmatprep.subr.bf16.mxu1 %v807_v47 }
 0x1c4   :  { %v184_v50 = vsub.f32 %v167_v41, %v183_v49  ;;  %v185_v51 = vsub.f32 %v172_v39, %v183_v49  ;;  %v557_v39 = vld [vmem:[%s1087_s2 + $0xf8] sm:$0xff]  ;;  %810 = vmatpush3.bf16.msra.mxu1 %v807_v47 }
 0x1c5   :  { %v803_v40 = vpack.c.bf16 %v557_v39, %v556_v38  ;;  %v395_v49 = vld [vmem:[%s1089_s4 + $0x18] sm:$0xff] }
 0x1c6   :  { %v186_v52 = vmul.f32 %v184_v50, %v184_v50  ;;  %v187_v53 = vmul.f32 %v185_v51, %v185_v51 }
 0x1c8   :  { %v188_v54 = vadd.f32 %v187_v53, %v186_v52  ;;  %v398_v53 = vld [vmem:[%s1089_s4 + $0x30] sm:$0xff] }
 0x1ca   :  { %v189_v55 = vrot.slane %v188_v54, 4 }
 0x1cc   :  { %v190_v56 = vadd.f32 %v189_v55, %v188_v54  ;;  %v399_v54 = vld [vmem:[%s1089_s4 + $0x38] sm:$0xff] }
 0x1cd   :  { %v819_v55 = vpack.c.bf16 %v399_v54, %v398_v53 }
 0x1ce   :  { %v191_v57 = vrot.slane %v190_v56, 2 }
 0x1d0   :  { %v192_v58 = vadd.f32 %v191_v57, %v190_v56  ;;  %v400_v56 = vld [vmem:[%s1089_s4 + $0x40] sm:$0xff]  ;;  %v401_v57 = vld [vmem:[%s1089_s4 + $0x48] sm:$0xff] }
 0x1d2   :  { %v193_v59 = vrot.slane %v192_v58, 1 }
 0x1d4   :  { %v194_v60 = vadd.f32 %v193_v59, %v192_v58  ;;  %v823_v58 = vpack.c.bf16 %v401_v57, %v400_v56  ;;  %v402_v59 = vld [vmem:[%s1089_s4 + $0x50] sm:$0xff] }
 0x1d6   :  { %v195_v61 = vmul.f32 0.0625, %v194_v60  ;;  %v403_v60 = vld [vmem:[%s1089_s4 + $0x58] sm:$0xff] }
 0x1d8   :  { %v196_v62 = vadd.f32 1e-05, %v195_v61  ;;  %v827_v61 = vpack.c.bf16 %v403_v60, %v402_v59 }
 0x1da   :  { %842 = vrsqrt.f32 %v196_v62  ;;  %v404_v62 = vld [vmem:[%s1089_s4 + $0x60] sm:$0xff] }
 0x1e4   :  { %v843_v3 = vpop.eup %842 }
 0x1e5   :  { %v198_v6 = vmul.f32 %v843_v3, %v184_v50  ;;  %v199_v7 = vmul.f32 %v843_v3, %v185_v51  ;;  %v396_v50 = vld [vmem:[%s1089_s4 + $0x20] sm:$0xff]  ;;  %v397_v51 = vld [vmem:[%s1089_s4 + $0x28] sm:$0xff] }
 0x1e6   :  { %v815_v52 = vpack.c.bf16 %v397_v51, %v396_v50 }
 0x1e7   :  { %v204_v8 = vmul.f32 %v203_v2, %v198_v6  ;;  %v205_v9 = vmul.f32 %v203_v2, %v199_v7  ;;  %v405_v2 = vld [vmem:[%s1089_s4 + $0x68] sm:$0xff]  ;;  %v407_v6 = vld [vmem:[%s1089_s4 + $0x78] sm:$0xff] }
 0x1e8   :  { %v831_v3 = vpack.c.bf16 %v405_v2, %v404_v62 }
 0x1e9   :  { %v210_v10 = vadd.f32 %v209_v5, %v204_v8  ;;  %v211_v11 = vadd.f32 %v209_v5, %v205_v9  ;;  %v406_v5 = vld [vmem:[%s1089_s4 + $0x70] sm:$0xff]  ;;  %v541_v8 = vld [vmem:[%s1088_s3 + $0x4] sm:$0x7] }
 0x1ea   :  { %v835_v7 = vpack.c.bf16 %v407_v6, %v406_v5  ;;  %v278_v9 = vrot.slane %v541_v8, %v98_v35  ;;  %v381_v36 = vrot.slane %v541_v8, %v202_v63 }
 0x1eb   :  { %v212_v14 = vmax.f32 %v210_v10, 0.0  ;;  %v213_v15 = vmax.f32 %v211_v11, 0.0 }
 0x1ed   :  { %v214_v17 = vpack.c.bf16 %v213_v15, %v212_v14 }
 0x1ef   :  { %662 = vmatpush3.bf16.msra.mxu0 %v214_v17 }
 0x1f0   :  { %776 = vmatprep.subr.bf16.mxu0 %v775_v16 }
 0x1f2   :  { %664 = vmatmul.mubr.msk.bf16.vlgmr.msra.gmra.mrb[4].mxu0 %vm34_vm1, %v895_v4 }
 0x1f3   :  { %778 = vmatpush3.bf16.msra.mxu0 %v775_v16 }
 0x1f4   :  { %780 = vmatprep.subr.bf16.mxu0 %v779_v20 }
 0x1f7   :  { %782 = vmatpush3.bf16.msra.mxu0 %v779_v20 }
 0x1f8   :  { %784 = vmatprep.subr.bf16.mxu0 %v783_v23 }
 0x1fb   :  { %786 = vmatpush3.bf16.msra.mxu0 %v783_v23 }
 0x1fc   :  { %788 = vmatprep.subr.bf16.mxu0 %v787_v26 }
 0x1ff   :  { %790 = vmatpush3.bf16.msra.mxu0 %v787_v26 }
 0x200   :  { %792 = vmatprep.subr.bf16.mxu0 %v791_v29 }
 0x203   :  { %794 = vmatpush3.bf16.msra.mxu0 %v791_v29 }
 0x204   :  { %796 = vmatprep.subr.bf16.mxu0 %v795_v32 }
 0x207   :  { %798 = vmatpush3.bf16.msra.mxu0 %v795_v32 }
 0x208   :  { %800 = vmatprep.subr.bf16.mxu0 %v799_v37 }
 0x20b   :  { %802 = vmatpush3.bf16.msra.mxu0 %v799_v37 }
 0x20c   :  { %804 = vmatprep.subr.bf16.mxu0 %v803_v40 }
 0x20f   :  { %806 = vmatpush3.bf16.msra.mxu0 %v803_v40  ;;  %v387_v40 = vrot.slane %v541_v8, %v208_v1 }
 0x210   :  { %737 = vmatprep.subr.bf16.mxu0 %v846_v0 }
 0x2c5   :  { %v249_v41 = vpop.f32.mrb[4].mxu0 }
 0x2c6   :  { %v665_v42 = vpop.f32.mrb[5].mxu0  ;;  %699 = vmatprep.mubr.f32.mxu0 %v249_v41 }
 0x2c7   :  { %v252_v43 = vpop.f32.mrb[6].mxu0 }
 0x2c8   :  { %700 = vmatmul.mubr.f32.vlgmr.msra.gmra.mrb[8].mxu0 %v252_v43  ;;  %v666_v44 = vpop.f32.mrb[7].mxu0 }
 0x2c9   :  { %739 = vmatprep.mubr.msk.bf16.mxu0 %vm847_vm0, %v846_v0  ;;  %v811_v0 = vpack.c.bf16 %v395_v49, %v394_v48 }
 0x2cb   :  { %812 = vmatprep.subr.bf16.mxu1 %v811_v0 }
 0x2cc   :  { %814 = vmatpush3.bf16.msra.mxu1 %v811_v0 }
 0x2cd   :  { %816 = vmatprep.subr.bf16.mxu1 %v815_v52 }
 0x2d0   :  { %818 = vmatpush3.bf16.msra.mxu1 %v815_v52 }
 0x2d1   :  { %820 = vmatprep.subr.bf16.mxu1 %v819_v55 }
 0x2d4   :  { %822 = vmatpush3.bf16.msra.mxu1 %v819_v55 }
 0x2d5   :  { %824 = vmatprep.subr.bf16.mxu1 %v823_v58 }
 0x2d8   :  { %826 = vmatpush3.bf16.msra.mxu1 %v823_v58 }
 0x2d9   :  { %828 = vmatprep.subr.bf16.mxu1 %v827_v61 }
 0x2dc   :  { %830 = vmatpush3.bf16.msra.mxu1 %v827_v61 }
 0x2dd   :  { %832 = vmatprep.subr.bf16.mxu1 %v831_v3 }
 0x2e0   :  { %834 = vmatpush3.bf16.msra.mxu1 %v831_v3 }
 0x2e1   :  { %836 = vmatprep.subr.bf16.mxu1 %v835_v7 }
 0x2e4   :  { %838 = vmatpush3.bf16.msra.mxu1 %v835_v7 }
 0x39b   :  { %v701_v10 = vpop.f32.mrb[8].mxu0 }
 0x39c   :  { %v351_v11 = vadd.f32 %v701_v10, %v278_v9  ;;  %v345_v12 = vpop.f32.mrb[9].mxu0 }
 0x39d   :  { %v346_v13 = vadd.f32 %v345_v12, %v278_v9 }
 0x39f   :  { %v354_v14 = vadd.f32 %v351_v11, %v346_v13 }
 0x3a1   :  { %v355_v15 = vrot.slane %v354_v14, 4 }
 0x3a3   :  { %v356_v16 = vadd.f32 %v355_v15, %v354_v14 }
 0x3a5   :  { %v357_v17 = vrot.slane %v356_v16, 2 }
 0x3a7   :  { %v358_v18 = vadd.f32 %v357_v17, %v356_v16 }
 0x3a9   :  { %v359_v19 = vrot.slane %v358_v18, 1 }
 0x3ab   :  { %v360_v20 = vadd.f32 %v359_v19, %v358_v18 }
 0x3ad   :  { %v361_v21 = vmul.f32 0.0625, %v360_v20 }
 0x3af   :  { %v362_v22 = vsub.f32 %v346_v13, %v361_v21  ;;  %v363_v23 = vsub.f32 %v351_v11, %v361_v21 }
 0x3b1   :  { %v364_v24 = vmul.f32 %v362_v22, %v362_v22  ;;  %v365_v25 = vmul.f32 %v363_v23, %v363_v23 }
 0x3b3   :  { %v366_v26 = vadd.f32 %v365_v25, %v364_v24 }
 0x3b5   :  { %v367_v27 = vrot.slane %v366_v26, 4 }
 0x3b7   :  { %v368_v28 = vadd.f32 %v367_v27, %v366_v26 }
 0x3b9   :  { %v369_v35 = vrot.slane %v368_v28, 2 }
 0x3bb   :  { %v370_v29 = vadd.f32 %v369_v35, %v368_v28 }
 0x3bd   :  { %v371_v30 = vrot.slane %v370_v29, 1 }
 0x3bf   :  { %v372_v31 = vadd.f32 %v371_v30, %v370_v29 }
 0x3c1   :  { %v373_v32 = vmul.f32 0.0625, %v372_v31 }
 0x3c3   :  { %v374_v33 = vadd.f32 1e-05, %v373_v32 }
 0x3c5   :  { %844 = vrsqrt.f32 %v374_v33 }
 0x3cf   :  { %v845_v37 = vpop.eup %844 }
 0x3d0   :  { %v376_v38 = vmul.f32 %v845_v37, %v362_v22  ;;  %v377_v39 = vmul.f32 %v845_v37, %v363_v23 }
 0x3d2   :  { %v382_v41 = vmul.f32 %v381_v36, %v376_v38  ;;  %v383_v42 = vmul.f32 %v381_v36, %v377_v39 }
 0x3d4   :  { %v388_v43 = vadd.f32 %v387_v40, %v382_v41  ;;  %v389_v44 = vadd.f32 %v387_v40, %v383_v42 }
 0x3d6   :  { %v390_v45 = vmax.f32 %v388_v43, 0.0  ;;  %v391_v46 = vmax.f32 %v389_v44, 0.0 }
 0x3d8   :  { %734 = vmatprep.mubr.f32.mxu1 %v390_v45 }
 0x3d9   :  { %735 = vmatmul.mubr.f32.vlgmr.msra.gmra.mrb[2].mxu1 %v391_v46 }
 0x4ac   :  { %v736_v47 = vpop.f32.mrb[2].mxu1 }
 0x4ad   :  { %v474_v48 = vpop.f32.mrb[3].mxu1 }
 0x4ae   :  { %v483_v49 = vpack.c.bf16 %v736_v47, %v474_v48 }
 0x4b0   :  { %738 = vmatpush3.bf16.msra.mxu0 %v483_v49 }
 0x4b3   :  { %740 = vmatmul.mubr.msk.bf16.vlgmr.msra.gmra.mrb[12].mxu0 %vm34_vm1, %v895_v4 }
 0x586   :  { %v525_v63 = vpop.f32.mrb[12].mxu0 }
 0x587   :  { %v526_v1 = vadd.f32 %v558_v34, %v525_v63  ;;  %v741_v0 = vpop.f32.mrb[13].mxu0 }
 0x588   :  { %v528_v50 = vpop.f32.mrb[14].mxu0 }
 0x589   :  { %532 = vst [vmem:[%s1091_s6] sm:$0xff] %v526_v1  ;;  %v529_v51 = vadd.f32 %v558_v34, %v528_v50  ;;  %v742_v52 = vpop.f32.mrb[15].mxu0 }
 0x58b   :  { %533 = vst [vmem:[%s1091_s6 + $0x8] sm:$0xff] %v529_v51 }

</bundles_post_ra>
